<compile_context>
chip_gen: v7x
topology: tpu7x:2x2x1
jax: 0.10.0
libtpu: 0.0.40
codegen_flags: <defaults>
</compile_context>

<pallas_src>
import functools

import numpy as np
import jax
import jax.numpy as jnp
from jax.experimental import pallas as pl
from jax.experimental.pallas import tpu as pltpu

SEGMENT_NUM = 10
PAD_UNIT = 127          # pad length = code * 127
NUM_PAD_CHOICES = 4     # np.random.randint(0, 4)


def _round_up(x, m):
    return (x + m - 1) // m * m


def _pad_kernel(x_ref, o_ref, *, groups, seg_len, out_len, eff_per_seg, batch):
    """One grid step == one group of segments (all batch rows at once).

    x_ref : (B, group_size*seg_len)        group's segments, VMEM
    o_ref : (group_size*B, out_len)        flat lane/sublane-dense slab block
    groups      : tuple of tuples of global segment ids per grid step (static)
    eff_per_seg : static per-segment effective pad length (already clipped)
    """

    def build_group(seg_ids):
        x = x_ref[...]
        rows = []
        for local, s in enumerate(seg_ids):
            seg = x[:, local * seg_len:(local + 1) * seg_len]
            eff = eff_per_seg[s]                    # static Python int
            if eff == 0:
                row = seg
            else:
                # Slice to the needed noise width BEFORE the sublane shift.
                src = seg[:, :eff]
                if batch == 1:
                    noise = src                     # j = -1 wraps to row 0
                else:
                    # rows 0..B-2 take row i+1, row B-1 takes row B-2.
                    noise = jnp.concatenate(
                        [src[1:, :], src[batch - 2:batch - 1, :]], axis=0)
                row = jnp.concatenate([noise, seg, noise], axis=-1)
            tail = out_len - row.shape[-1]
            if tail:
                row = jnp.concatenate(
                    [row, jnp.zeros((batch, tail), dtype=row.dtype)], axis=-1)
            rows.append(row)
        # Single unmasked, lane- and sublane-dense full-block store.
        o_ref[...] = jnp.concatenate(rows, axis=0)

    if len(groups) == 1:
        build_group(groups[0])
    else:
        pid = pl.program_id(0)
        for g, seg_ids in enumerate(groups):
            # Exactly one branch is taken per grid step; cold paths are skipped.
            @pl.when(pid == g)
            def _(seg_ids=seg_ids):
                build_group(seg_ids)


def pad_forward_slab(audios, pad_codes, num_steps=1):
    """Kernel-level entry point.

    audios    : [B, L] float array.
    pad_codes : length-SEGMENT_NUM sequence of Python ints in [0, 4); segment s
                gets pad length pad_codes[s] * 127 (clipped to seg_len, same as
                torch slicing).  Shape-determining, hence static.
    num_steps : grid steps.  1 (default) is best on single-TC v5e/v6e; 2 lets
                v7x shard the segment groups across its two TensorCores
                (auto-falls back to 1 if the tiling constraints are not met).

    Returns (slab3 [SEGMENT_NUM, B, max_out_len], seg_view [B, SEGMENT_NUM,
    seg_len], out_lens tuple) — zero-copy views; consumers slice in their jit.
    """
    B, L = audios.shape
    assert B >= 1
    seg_len = L // SEGMENT_NUM
    assert seg_len >= 1, "audio too short to split into 10 segments"
    trunc = seg_len * SEGMENT_NUM

    codes = [int(c) for c in pad_codes]
    assert len(codes) == SEGMENT_NUM
    assert all(0 <= c < NUM_PAD_CHOICES for c in codes), "pad code out of range"
    eff_per_seg = tuple(min(c * PAD_UNIT, seg_len) for c in codes)

    # Slab sized to the largest code actually drawn (128-multiple lane width).
    max_eff = max(eff_per_seg)
    max_out_len = _round_up(seg_len + 2 * max_eff, 128)

    # Pick a legal grid: block shapes must be full-extent or (8, 128)-aligned.
    if num_steps > 1:
        if (SEGMENT_NUM % num_steps
                or ((SEGMENT_NUM // num_steps) * B) % 8
                or ((SEGMENT_NUM // num_steps) * seg_len) % 128):
            num_steps = 1
    group = SEGMENT_NUM // num_steps
    groups = tuple(tuple(range(g * group, (g + 1) * group))
                   for g in range(num_steps))

    x = audios if trunc == L else audios[:, :trunc]   # drop trailing samples

    kernel = functools.partial(
        _pad_kernel, groups=groups, seg_len=seg_len, out_len=max_out_len,
        eff_per_seg=eff_per_seg, batch=B)

    slab = pl.pallas_call(
        kernel,
        out_shape=jax.ShapeDtypeStruct((SEGMENT_NUM * B, max_out_len),
                                       audios.dtype),
        grid=(num_steps,),
        in_specs=[pl.BlockSpec((B, group * seg_len), lambda g: (0, g))],
        out_specs=pl.BlockSpec((group * B, max_out_len), lambda g: (g, 0)),
        compiler_params=pltpu.CompilerParams(
            dimension_semantics=("parallel",)),
    )(x)

    slab3 = slab.reshape(SEGMENT_NUM, B, max_out_len)     # zero-copy view
    seg_view = x.reshape(B, SEGMENT_NUM, seg_len)          # zero-copy view
    out_lens = tuple(seg_len + 2 * e for e in eff_per_seg)
    return slab3, seg_view, out_lens


def pad_forward(audios, pad_codes, num_steps=1):
    """Module-compatible wrapper: returns [segments, padded_segments, 'pad'].

    For traffic-sensitive callers prefer `pad_forward_slab` (no extra copies).
    """
    slab3, seg_view, out_lens = pad_forward_slab(audios, pad_codes, num_steps)
    segments = [seg_view[:, s, :] for s in range(SEGMENT_NUM)]
    padded = [slab3[s, :, :out_lens[s]] for s in range(SEGMENT_NUM)]
    return [segments, padded, 'pad']


def _reference(audios_np, pad_codes):
    """Pure-numpy replica of the PyTorch code (including noise clipping)."""
    B, L = audios_np.shape
    seg_len = L // SEGMENT_NUM
    segs = [audios_np[:, seg_len * s: seg_len * (s + 1)]
            for s in range(SEGMENT_NUM)]
    padded = []
    for seg, code in zip(segs, pad_codes):
        pad_len = code * PAD_UNIT
        rows = []
        for i in range(B):
            j = i + 1 if i < B - 1 else i - 1
            noise = seg[j, :pad_len]  # clips like torch if pad_len > seg_len
            rows.append(np.concatenate([noise, seg[i], noise])[None])
        padded.append(np.concatenate(rows, 0))
    return segs, padded


if __name__ == "__main__":
    B, L = 2, 5120                      # 10 segments of 512 samples each
    key = jax.random.PRNGKey(0)
    audios = jax.random.normal(key, (B, L), dtype=jnp.float32)

    # Deterministic stand-in for the module's per-segment np.random.randint(0, 4).
    # TODO(synk): pad lengths are shape-determining, so true per-forward-call
    # randomness of the original layer would require a retrace per draw; codes
    # are drawn host-side from a fixed seed instead.
    pad_codes = np.random.RandomState(0).randint(
        0, NUM_PAD_CHOICES, size=SEGMENT_NUM).tolist()

    segments, padded, tag = pad_forward(audios, pad_codes)
    padded = [jax.block_until_ready(p) for p in padded]

    # Validate against a pure-numpy reference of the PyTorch semantics.
    ref_segs, ref_padded = _reference(np.asarray(audios), pad_codes)
    for got, want in zip(padded, ref_padded):
        np.testing.assert_allclose(np.asarray(got), want, rtol=0, atol=0)
    for got, want in zip(segments, ref_segs):
        np.testing.assert_allclose(np.asarray(got), want, rtol=0, atol=0)
    assert tag == 'pad'
    print("KERNEL_OK")
</pallas_src>

<mosaic_0001>
module attributes {stable_mosaic.version = 11 : i64} {
  func.func @_pad_kernel(%arg0: i32, %arg1: memref<2x5120xf32, #tpu.memory_space<vmem>>, %arg2: memref<20x1280xf32, #tpu.memory_space<vmem>>) attributes {dimension_semantics = [#tpu.dimension_semantics<parallel>], iteration_bounds = array<i64: 1>, scalar_prefetch = 0 : i64, scratch_operands = 0 : i64, tpu.core_type = #tpu.core_type<tc>, window_params = [{transform_indices = @transform_0, window_bounds = array<i64: 2, 5120>}, {transform_indices = @transform_1, window_bounds = array<i64: 20, 1280>}]} {
    %c0 = arith.constant 0 : index
    %c0_0 = arith.constant 0 : index
    %0 = vector.load %arg1[%c0, %c0_0] : memref<2x5120xf32, #tpu.memory_space<vmem>>, vector<2x5120xf32>
    %1 = vector.extract_strided_slice %0 {offsets = [0, 0], sizes = [2, 512], strides = [1, 1]} : vector<2x5120xf32> to vector<2x512xf32>
    %cst = arith.constant 0.000000e+00 : f32
    %2 = vector.broadcast %cst : f32 to vector<2x768xf32>
    %3 = tpu.concatenate %1, %2 in 1 : vector<2x512xf32>, vector<2x768xf32> -> vector<2x1280xf32>
    %4 = vector.extract_strided_slice %0 {offsets = [0, 512], sizes = [2, 512], strides = [1, 1]} : vector<2x5120xf32> to vector<2x512xf32>
    %5 = vector.extract_strided_slice %4 {offsets = [0, 0], sizes = [2, 381], strides = [1, 1]} : vector<2x512xf32> to vector<2x381xf32>
    %6 = vector.extract_strided_slice %5 {offsets = [1, 0], sizes = [1, 381], strides = [1, 1]} : vector<2x381xf32> to vector<1x381xf32>
    %7 = vector.extract_strided_slice %5 {offsets = [0, 0], sizes = [1, 381], strides = [1, 1]} : vector<2x381xf32> to vector<1x381xf32>
    %8 = tpu.concatenate %6, %7 in 0 : vector<1x381xf32>, vector<1x381xf32> -> vector<2x381xf32>
    %9 = tpu.concatenate %8, %4, %8 in 1 : vector<2x381xf32>, vector<2x512xf32>, vector<2x381xf32> -> vector<2x1274xf32>
    %cst_1 = arith.constant 0.000000e+00 : f32
    %10 = vector.broadcast %cst_1 : f32 to vector<2x6xf32>
    %11 = tpu.concatenate %9, %10 in 1 : vector<2x1274xf32>, vector<2x6xf32> -> vector<2x1280xf32>
    %12 = vector.extract_strided_slice %0 {offsets = [0, 1024], sizes = [2, 512], strides = [1, 1]} : vector<2x5120xf32> to vector<2x512xf32>
    %13 = vector.extract_strided_slice %12 {offsets = [0, 0], sizes = [2, 127], strides = [1, 1]} : vector<2x512xf32> to vector<2x127xf32>
    %14 = vector.extract_strided_slice %13 {offsets = [1, 0], sizes = [1, 127], strides = [1, 1]} : vector<2x127xf32> to vector<1x127xf32>
    %15 = vector.extract_strided_slice %13 {offsets = [0, 0], sizes = [1, 127], strides = [1, 1]} : vector<2x127xf32> to vector<1x127xf32>
    %16 = tpu.concatenate %14, %15 in 0 : vector<1x127xf32>, vector<1x127xf32> -> vector<2x127xf32>
    %17 = tpu.concatenate %16, %12, %16 in 1 : vector<2x127xf32>, vector<2x512xf32>, vector<2x127xf32> -> vector<2x766xf32>
    %cst_2 = arith.constant 0.000000e+00 : f32
    %18 = vector.broadcast %cst_2 : f32 to vector<2x514xf32>
    %19 = tpu.concatenate %17, %18 in 1 : vector<2x766xf32>, vector<2x514xf32> -> vector<2x1280xf32>
    %20 = vector.extract_strided_slice %0 {offsets = [0, 1536], sizes = [2, 512], strides = [1, 1]} : vector<2x5120xf32> to vector<2x512xf32>
    %cst_3 = arith.constant 0.000000e+00 : f32
    %21 = vector.broadcast %cst_3 : f32 to vector<2x768xf32>
    %22 = tpu.concatenate %20, %21 in 1 : vector<2x512xf32>, vector<2x768xf32> -> vector<2x1280xf32>
    %23 = vector.extract_strided_slice %0 {offsets = [0, 2048], sizes = [2, 512], strides = [1, 1]} : vector<2x5120xf32> to vector<2x512xf32>
    %24 = vector.extract_strided_slice %23 {offsets = [0, 0], sizes = [2, 381], strides = [1, 1]} : vector<2x512xf32> to vector<2x381xf32>
    %25 = vector.extract_strided_slice %24 {offsets = [1, 0], sizes = [1, 381], strides = [1, 1]} : vector<2x381xf32> to vector<1x381xf32>
    %26 = vector.extract_strided_slice %24 {offsets = [0, 0], sizes = [1, 381], strides = [1, 1]} : vector<2x381xf32> to vector<1x381xf32>
    %27 = tpu.concatenate %25, %26 in 0 : vector<1x381xf32>, vector<1x381xf32> -> vector<2x381xf32>
    %28 = tpu.concatenate %27, %23, %27 in 1 : vector<2x381xf32>, vector<2x512xf32>, vector<2x381xf32> -> vector<2x1274xf32>
    %cst_4 = arith.constant 0.000000e+00 : f32
    %29 = vector.broadcast %cst_4 : f32 to vector<2x6xf32>
    %30 = tpu.concatenate %28, %29 in 1 : vector<2x1274xf32>, vector<2x6xf32> -> vector<2x1280xf32>
    %31 = vector.extract_strided_slice %0 {offsets = [0, 2560], sizes = [2, 512], strides = [1, 1]} : vector<2x5120xf32> to vector<2x512xf32>
    %32 = vector.extract_strided_slice %31 {offsets = [0, 0], sizes = [2, 381], strides = [1, 1]} : vector<2x512xf32> to vector<2x381xf32>
    %33 = vector.extract_strided_slice %32 {offsets = [1, 0], sizes = [1, 381], strides = [1, 1]} : vector<2x381xf32> to vector<1x381xf32>
    %34 = vector.extract_strided_slice %32 {offsets = [0, 0], sizes = [1, 381], strides = [1, 1]} : vector<2x381xf32> to vector<1x381xf32>
    %35 = tpu.concatenate %33, %34 in 0 : vector<1x381xf32>, vector<1x381xf32> -> vector<2x381xf32>
    %36 = tpu.concatenate %35, %31, %35 in 1 : vector<2x381xf32>, vector<2x512xf32>, vector<2x381xf32> -> vector<2x1274xf32>
    %cst_5 = arith.constant 0.000000e+00 : f32
    %37 = vector.broadcast %cst_5 : f32 to vector<2x6xf32>
    %38 = tpu.concatenate %36, %37 in 1 : vector<2x1274xf32>, vector<2x6xf32> -> vector<2x1280xf32>
    %39 = vector.extract_strided_slice %0 {offsets = [0, 3072], sizes = [2, 512], strides = [1, 1]} : vector<2x5120xf32> to vector<2x512xf32>
    %40 = vector.extract_strided_slice %39 {offsets = [0, 0], sizes = [2, 381], strides = [1, 1]} : vector<2x512xf32> to vector<2x381xf32>
    %41 = vector.extract_strided_slice %40 {offsets = [1, 0], sizes = [1, 381], strides = [1, 1]} : vector<2x381xf32> to vector<1x381xf32>
    %42 = vector.extract_strided_slice %40 {offsets = [0, 0], sizes = [1, 381], strides = [1, 1]} : vector<2x381xf32> to vector<1x381xf32>
    %43 = tpu.concatenate %41, %42 in 0 : vector<1x381xf32>, vector<1x381xf32> -> vector<2x381xf32>
    %44 = tpu.concatenate %43, %39, %43 in 1 : vector<2x381xf32>, vector<2x512xf32>, vector<2x381xf32> -> vector<2x1274xf32>
    %cst_6 = arith.constant 0.000000e+00 : f32
    %45 = vector.broadcast %cst_6 : f32 to vector<2x6xf32>
    %46 = tpu.concatenate %44, %45 in 1 : vector<2x1274xf32>, vector<2x6xf32> -> vector<2x1280xf32>
    %47 = vector.extract_strided_slice %0 {offsets = [0, 3584], sizes = [2, 512], strides = [1, 1]} : vector<2x5120xf32> to vector<2x512xf32>
    %48 = vector.extract_strided_slice %47 {offsets = [0, 0], sizes = [2, 381], strides = [1, 1]} : vector<2x512xf32> to vector<2x381xf32>
    %49 = vector.extract_strided_slice %48 {offsets = [1, 0], sizes = [1, 381], strides = [1, 1]} : vector<2x381xf32> to vector<1x381xf32>
    %50 = vector.extract_strided_slice %48 {offsets = [0, 0], sizes = [1, 381], strides = [1, 1]} : vector<2x381xf32> to vector<1x381xf32>
    %51 = tpu.concatenate %49, %50 in 0 : vector<1x381xf32>, vector<1x381xf32> -> vector<2x381xf32>
    %52 = tpu.concatenate %51, %47, %51 in 1 : vector<2x381xf32>, vector<2x512xf32>, vector<2x381xf32> -> vector<2x1274xf32>
    %cst_7 = arith.constant 0.000000e+00 : f32
    %53 = vector.broadcast %cst_7 : f32 to vector<2x6xf32>
    %54 = tpu.concatenate %52, %53 in 1 : vector<2x1274xf32>, vector<2x6xf32> -> vector<2x1280xf32>
    %55 = vector.extract_strided_slice %0 {offsets = [0, 4096], sizes = [2, 512], strides = [1, 1]} : vector<2x5120xf32> to vector<2x512xf32>
    %56 = vector.extract_strided_slice %55 {offsets = [0, 0], sizes = [2, 127], strides = [1, 1]} : vector<2x512xf32> to vector<2x127xf32>
    %57 = vector.extract_strided_slice %56 {offsets = [1, 0], sizes = [1, 127], strides = [1, 1]} : vector<2x127xf32> to vector<1x127xf32>
    %58 = vector.extract_strided_slice %56 {offsets = [0, 0], sizes = [1, 127], strides = [1, 1]} : vector<2x127xf32> to vector<1x127xf32>
    %59 = tpu.concatenate %57, %58 in 0 : vector<1x127xf32>, vector<1x127xf32> -> vector<2x127xf32>
    %60 = tpu.concatenate %59, %55, %59 in 1 : vector<2x127xf32>, vector<2x512xf32>, vector<2x127xf32> -> vector<2x766xf32>
    %cst_8 = arith.constant 0.000000e+00 : f32
    %61 = vector.broadcast %cst_8 : f32 to vector<2x514xf32>
    %62 = tpu.concatenate %60, %61 in 1 : vector<2x766xf32>, vector<2x514xf32> -> vector<2x1280xf32>
    %63 = vector.extract_strided_slice %0 {offsets = [0, 4608], sizes = [2, 512], strides = [1, 1]} : vector<2x5120xf32> to vector<2x512xf32>
    %64 = vector.extract_strided_slice %63 {offsets = [0, 0], sizes = [2, 381], strides = [1, 1]} : vector<2x512xf32> to vector<2x381xf32>
    %65 = vector.extract_strided_slice %64 {offsets = [1, 0], sizes = [1, 381], strides = [1, 1]} : vector<2x381xf32> to vector<1x381xf32>
    %66 = vector.extract_strided_slice %64 {offsets = [0, 0], sizes = [1, 381], strides = [1, 1]} : vector<2x381xf32> to vector<1x381xf32>
    %67 = tpu.concatenate %65, %66 in 0 : vector<1x381xf32>, vector<1x381xf32> -> vector<2x381xf32>
    %68 = tpu.concatenate %67, %63, %67 in 1 : vector<2x381xf32>, vector<2x512xf32>, vector<2x381xf32> -> vector<2x1274xf32>
    %cst_9 = arith.constant 0.000000e+00 : f32
    %69 = vector.broadcast %cst_9 : f32 to vector<2x6xf32>
    %70 = tpu.concatenate %68, %69 in 1 : vector<2x1274xf32>, vector<2x6xf32> -> vector<2x1280xf32>
    %71 = tpu.concatenate %3, %11, %19, %22, %30, %38, %46, %54, %62, %70 in 0 : vector<2x1280xf32>, vector<2x1280xf32>, vector<2x1280xf32>, vector<2x1280xf32>, vector<2x1280xf32>, vector<2x1280xf32>, vector<2x1280xf32>, vector<2x1280xf32>, vector<2x1280xf32>, vector<2x1280xf32> -> vector<20x1280xf32>
    %c0_10 = arith.constant 0 : index
    %c0_11 = arith.constant 0 : index
    %72 = vector.load %arg2[%c0_10, %c0_11] : memref<20x1280xf32, #tpu.memory_space<vmem>>, vector<20x1280xf32>
    tpu.vector_store %arg2[%c0_10, %c0_11], %71 {strides = array<i32>} : memref<20x1280xf32, #tpu.memory_space<vmem>>, vector<20x1280xf32>,
    return
  }
  func.func @transform_0(%arg0: i32) -> (i32, i32) {
    %c0_i32 = arith.constant 0 : i32
    %c0_i32_0 = arith.constant 0 : i32
    return %c0_i32, %arg0 : i32, i32
  }
  func.func @transform_1(%arg0: i32) -> (i32, i32) {
    %c0_i32 = arith.constant 0 : i32
    %c0_i32_0 = arith.constant 0 : i32
    return %arg0, %c0_i32 : i32, i32
  }
}

</mosaic_0001>

<bundles_post_ra>
// kernel: tpu_custom_call.1
= control target key start
LH: loop header
LB: loop body
LE: loop exit
PB: predicated region body
PF: predicated region fallthrough
CT: control target
= control target key end

     0   :  { %6 = vsyncpa [#allocation3], 0  ;;  %s1472_s0 = inlined_call_operand.hbm [shape: f32[2,5120], index: 0, kind: input, shape index: {}]   ;;  %s1473_s1 = inlined_call_operand.hbm [shape: f32[20,1280], index: 1, kind: output, shape index: {}]  }
   0x1   :  { %7 = vsyncpa [#allocation4], 0  ;;  %s991_s6 = smov [#allocation2]   ;;  %s943_s10 = scalar_lea.hbm %s1472_s0, 1280 }
   0x2   :  { %s14_s7 = sshll.u32 %s991_s6, 4  ;;  %p944_p0 = scmp.ne.s32.totalorder %s1472_s0, %s943_s10  ;;  %s15_s7 = int_to_ptr.vmem [resolvable:$true] %s14_s7 }
   0x3   :  { %p947_p1 = scmp.lt.u32.totalorder %s943_s10, %s1472_s0 }
   0x5   :  { %p949_p2 = pnand %p947_p1, %p944_p0 }
   0x7   :  { %952 = shalt.err (!%p949_p2)
}
   0x8   :  { %s953_s15 = scalar_lea.vmem %s15_s7, 1280  ;;  %p958_p4 = scmp.lt.s32.totalorder %s15_s7, %s15_s7 }
   0x9   :  { %p954_p3 = scmp.ne.s32.totalorder %s15_s7, %s953_s15  ;;  %p959_p5 = scmp.lt.s32.totalorder %s953_s15, %s953_s15 }
   0xb   :  { %p960_p6 = por %p959_p5, %p958_p4 }
   0xd   :  { %p961_p7 = pnand %p960_p6, %p954_p3 }
   0xf   :  { %964 = shalt.err (!%p961_p7)
}
  0x10   :  { %17 = dma.hbm_to_vmem [thread:$0]  %s1472_s0, 1280, %s15_s7, [#allocation3]  }
  0x11   :  { %987 = dma.done.wait [#allocation3], 1280  }
  0x12   :  { %988 = vsyncadd [#allocation3], 4294966016  ;;  %v36_v0 = vlaneseq  ;;  %v992_v1 = vmov 1983009808   ;;  %v1031_v10 = vld [vmem:[#allocation2 + $0x10] sm:$0xff]  ;;  %v22_v11 = vld [vmem:[#allocation2 + $0x8] sm:$0xff] }
  0x13   :  { %v34_v2 = vunpack.c.l.s4 %v992_v1  ;;  %vm84_vm0 = vcmask 1040384   ;;  %v1033_v12 = vld [vmem:[#allocation2] sm:$0xff]  ;;  %s993_s0 = smov 127   ;;  %s994_s18 = smov 125   ;;  %v88_v23 = vcombine.high %v22_v11, %v22_v11  ;;  %vm805_vm1 = vcmask 1041408   ;;  %v1071_v37 = vld [vmem:[#allocation2 + $0x28] sm:$0xff] }
  0x14   :  { %v37_v3 = vshrl.u32 %v36_v0, 7  ;;  %v148_v36 = vcombine.high %v1031_v10, %v1031_v10  ;;  %v1075_v39 = vld [vmem:[#allocation2 + $0x20] sm:$0xff]  ;;  %v1099_v51 = vld [vmem:[#allocation2 + $0x30] sm:$0xff]  ;;  %vm816_vm2 = vcmask 1043456   ;;  %vm827_vm3 = vcmask 1045504   ;;  %s996_s19 = smov [#allocation5]  }
  0x15   :  { %v35_v4 = vunpack.c.0.s8 %v34_v2  ;;  %v239_v61 = vcombine.high %v1075_v39, %v1075_v39  ;;  %vm173_vm4 = vcmask 1039360   ;;  %vm113_vm5 = vcmask 1022976   ;;  %s913_s20 = sshll.u32 %s996_s19, 4  ;;  %s914_s20 = int_to_ptr.vmem [resolvable:$true] %s913_s20 }
  0x16   :  { %v1021_v5 = vsub.s32 3, %v37_v3  ;;  %v1023_v6 = vsub.s32 2, %v37_v3  ;;  %v1027_v8 = vsub.s32 1, %v37_v3  ;;  %v1029_v9 = vsub.s32 0, %v37_v3  ;;  %s965_s21 = scalar_lea.vmem %s914_s20, 3840  ;;  %p970_p9 = scmp.lt.s32.totalorder %s914_s20, %s914_s20 }
  0x17   :  { %v1025_v7 = vsub.s32 %v35_v4, %v37_v3  ;;  %v1035_v13 = vsub.s32 5, %v37_v3  ;;  %v1037_v14 = vsub.s32 4, %v37_v3  ;;  %v1129_v3 = vld [vmem:[#allocation2 + $0x38] sm:$0xff]  ;;  %vm134_vm6 = vcmask 998400   ;;  %p966_p8 = scmp.ne.s32.totalorder %s914_s20, %s965_s21  ;;  %p971_p10 = scmp.lt.s32.totalorder %s965_s21, %s965_s21 }
  0x18   :  { %v61_v17 = vrot.slane %v22_v11, %v1021_v5  ;;  %v76_v18 = vrot.slane %v22_v11, %v1023_v6  ;;  %v57_v20 = vrot.slane %v22_v11, %v1027_v8  ;;  %v72_v21 = vrot.slane %v22_v11, %v1029_v9 }
  0x19   :  { %v155_v15 = vrot.slane %v1031_v10, %v1025_v7  ;;  %v95_v16 = vrot.slane %v22_v11, %v1025_v7  ;;  %v39_v19 = vrot.slane %v1033_v12, %v1025_v7  ;;  %v65_v28 = vrot.slane %v22_v11, %v1035_v13  ;;  %p972_p11 = por %p971_p10, %p970_p9 }
  0x1a   :  { %v86_v22 = vsel %vm84_vm0, %v61_v17, %v76_v18  ;;  %v85_v26 = vsel %vm84_vm0, %v57_v20, %v72_v21  ;;  %v80_v29 = vrot.slane %v22_v11, %v1037_v14  ;;  %v102_v32 = vrot.slane %v88_v23, %v1025_v7 }
  0x1b   :  { %165 = vrot.lane.b32.xlu1 %v155_v15, %s993_s0  ;;  %105 = vrot.lane.b32.xlu0 %v95_v16, %s994_s18  ;;  %v47_v24 = vcombine.high %v39_v19, %v39_v19  ;;  %v666_v25 = vrot.slane %v86_v22, 6  ;;  %v665_v27 = vrot.slane %v85_v26, 6  ;;  %v103_v34 = vcombine.high %v95_v16, %v95_v16  ;;  %p973_p12 = pnand %p972_p11, %p966_p8 }
  0x1c   :  { %v1064_v33 = vsel %vm84_vm0, %v65_v28, %v80_v29  ;;  %v104_v35 = vcombine.high %v102_v32, %v102_v32  ;;  %v294_v38 = vrot.slane %v1071_v37, %v1027_v8  ;;  %v309_v40 = vrot.slane %v1071_v37, %v1029_v9  ;;  %v1163_v29 = vld [vmem:[#allocation2 + $0x48] sm:$0xff] }
  0x1d   :  { %v1055_v30 = vsel %vm805_vm1, %v47_v24, %v666_v25  ;;  %v1060_v31 = vsel %vm805_vm1, %v39_v19, %v665_v27  ;;  %v163_v41 = vcombine.high %v155_v15, %v155_v15  ;;  %v298_v42 = vrot.slane %v1071_v37, %v1021_v5 }
  0x1e   :  { %v313_v43 = vrot.slane %v1071_v37, %v1023_v6  ;;  %v162_v44 = vrot.slane %v148_v36, %v1025_v7  ;;  %v140_v45 = vrot.slane %v1031_v10, %v1027_v8  ;;  %v145_v46 = vrot.slane %v1031_v10, %v1029_v9 }
  0x1f   :  { %124 = vrot.lane.b32.xlu1 %v86_v22, %s994_s18  ;;  %122 = vrot.lane.b32.xlu0 %v85_v26, %s994_s18  ;;  %v246_v47 = vrot.slane %v1075_v39, %v1025_v7  ;;  %v209_v48 = vrot.slane %v1075_v39, %v1027_v8  ;;  %v224_v49 = vrot.slane %v1075_v39, %v1029_v9  ;;  %vm185_vm7 = vcmask 1031168  }
  0x20   :  { %v1097_v50 = vsel %vm84_vm0, %v294_v38, %v309_v40  ;;  %v213_v52 = vrot.slane %v1075_v39, %v1021_v5  ;;  %v378_v54 = vrot.slane %v1099_v51, %v1021_v5  ;;  %v393_v55 = vrot.slane %v1099_v51, %v1023_v6 }
  0x21   :  { %v716_v53 = vrot.slane %v1097_v50, 6  ;;  %v228_v56 = vrot.slane %v1075_v39, %v1023_v6  ;;  %v1111_v57 = vsel %vm84_vm0, %v298_v42, %v313_v43  ;;  %v374_v58 = vrot.slane %v1099_v51, %v1027_v8 }
  0x22   :  { %v389_v59 = vrot.slane %v1099_v51, %v1029_v9  ;;  %v164_v60 = vcombine.high %v162_v44, %v162_v44  ;;  %v717_v62 = vrot.slane %v1111_v57, 6  ;;  %v1123_v63 = vsel %vm84_vm0, %v140_v45, %v145_v46  ;;  %v1187_v45 = vld [vmem:[#allocation2 + $0x40] sm:$0xff] }
  0x23   :  { %109 = vrot.lane.b32.xlu1 %v102_v32, %s994_s18  ;;  %126 = vrot.lane.b32.xlu0 %v1064_v33, %s994_s18  ;;  %v254_v0 = vcombine.high %v246_v47, %v246_v47  ;;  %v236_v1 = vsel %vm84_vm0, %v209_v48, %v224_v49  ;;  %v1133_v10 = vsel %vm84_vm0, %v378_v54, %v393_v55 }
  0x24   :  { %v1127_v2 = vsel %vm84_vm0, %v374_v58, %v389_v59  ;;  %v838_v4 = vsel %vm805_vm1, %v236_v1, %v716_v53  ;;  %v454_v15 = vrot.slane %v1129_v3, %v1027_v8  ;;  %v237_v16 = vsel %vm84_vm0, %v213_v52, %v228_v56 }
  0x25   :  { %v739_v11 = vrot.slane %v1127_v2, 4  ;;  %v740_v17 = vrot.slane %v1133_v10, 4  ;;  %v469_v18 = vrot.slane %v1129_v3, %v1029_v9  ;;  %v462_v19 = vrot.slane %v1129_v3, %v1035_v13 }
  0x26   :  { %v253_v20 = vrot.slane %v239_v61, %v1025_v7  ;;  %v839_v21 = vsel %vm805_vm1, %v237_v16, %v717_v62  ;;  %v477_v22 = vrot.slane %v1129_v3, %v1037_v14  ;;  %v458_v25 = vrot.slane %v1129_v3, %v1021_v5 }
  0x27   :  { %111 = vrot.lane.b32.xlu1 %v104_v35, %s994_s18  ;;  %107 = vrot.lane.b32.xlu0 %v103_v34, %s994_s18  ;;  %v848_v23 = vsel %vm816_vm2, %v838_v4, %v739_v11  ;;  %v1153_v24 = vsel %vm84_vm0, %v454_v15, %v469_v18  ;;  %v473_v26 = vrot.slane %v1129_v3, %v1023_v6 }
  0x28   :  { %v762_v27 = vrot.slane %v1153_v24, 2  ;;  %v1161_v28 = vsel %vm84_vm0, %v462_v19, %v477_v22  ;;  %v849_v32 = vsel %vm816_vm2, %v839_v21, %v740_v17  ;;  %v590_v35 = vrot.slane %v1163_v29, %v1021_v5 }
  0x29   :  { %v1167_v34 = vsel %vm84_vm0, %v458_v25, %v473_v26  ;;  %v605_v36 = vrot.slane %v1163_v29, %v1023_v6  ;;  %v255_v38 = vcombine.high %v253_v20, %v253_v20  ;;  %v586_v42 = vrot.slane %v1163_v29, %v1027_v8  ;;  %v24_v25 = vld [vmem:[#allocation2 + $0x18] sm:$0xff] }
  0x2a   :  { %v858_v40 = vsel %vm827_vm3, %v848_v23, %v762_v27  ;;  %v601_v5 = vrot.slane %v1163_v29, %v1029_v9  ;;  %v594_v6 = vrot.slane %v1163_v29, %v1035_v13  ;;  %v609_v46 = vrot.slane %v1163_v29, %v1037_v14 }
  0x2b   :  { %169 = vrot.lane.b32.xlu1 %v162_v44, %s993_s0  ;;  %167 = vrot.lane.b32.xlu0 %v163_v41, %s993_s0  ;;  %v763_v41 = vrot.slane %v1167_v34, 2  ;;  %888 = vst [vmem:[#allocation5 + $0x50] sm:$0xff] %v858_v40  ;;  %v1180_v43 = vsel %vm84_vm0, %v590_v35, %v605_v36  ;;  %v534_v48 = vrot.slane %v1187_v45, %v1027_v8 }
  0x2c   :  { %v1199_v49 = vsel %vm84_vm0, %v594_v6, %v609_v46  ;;  %v539_v52 = vrot.slane %v1187_v45, %v1029_v9  ;;  %v217_v53 = vrot.slane %v1075_v39, %v1035_v13  ;;  %v232_v54 = vrot.slane %v1075_v39, %v1037_v14 }
  0x2d   :  { %v859_v44 = vsel %vm827_vm3, %v849_v32, %v763_v41  ;;  %v331_v8 = vrot.slane %v1071_v37, %v1025_v7  ;;  %v324_v56 = vcombine.high %v1071_v37, %v1071_v37  ;;  %v317_v61 = vrot.slane %v1071_v37, %v1037_v14 }
  0x2e   :  { %889 = vst [vmem:[#allocation5 + $0x58] sm:$0xff] %v859_v44  ;;  %v1208_v55 = vsel %vm84_vm0, %v534_v48, %v539_v52  ;;  %v1217_v9 = vsel %vm84_vm0, %v217_v53, %v232_v54  ;;  %v411_v62 = vrot.slane %v1099_v51, %v1025_v7  ;;  %v382_v11 = vrot.slane %v1099_v51, %v1035_v13 }
  0x2f   :  { %180 = vrot.lane.b32.xlu1 %v1123_v63, %s993_s0  ;;  %171 = vrot.lane.b32.xlu0 %v164_v60, %s993_s0  ;;  %v338_v39 = vrot.slane %v324_v56, %v1025_v7  ;;  %v339_v58 = vcombine.high %v331_v8, %v331_v8  ;;  %v302_v60 = vrot.slane %v1071_v37, %v1035_v13 }
  0x30   :  { %v419_v37 = vcombine.high %v411_v62, %v411_v62  ;;  %v397_v15 = vrot.slane %v1099_v51, %v1037_v14  ;;  %v542_v21 = vcombine.high %v1187_v45, %v1187_v45  ;;  %v195_v26 = vrot.slane %v24_v25, %v1025_v7 }
  0x31   :  { %v340_v59 = vcombine.high %v338_v39, %v338_v39  ;;  %v188_v52 = vcombine.high %v24_v25, %v24_v25 }
  0x32   :  { %v1261_v17 = vsel %vm84_vm0, %v382_v11, %v397_v15  ;;  %v556_v22 = vrot.slane %v542_v21, %v1025_v7  ;;  %v703_v32 = vrot.slane %v195_v26, 2 }
  0x33   :  { %258 = vrot.lane.b32.xlu1 %v254_v0, %s994_s18  ;;  %256 = vrot.lane.b32.xlu0 %v246_v47, %s994_s18  ;;  %v1192_v47 = vsel %vm84_vm0, %v586_v42, %v601_v5  ;;  %v404_v0 = vcombine.high %v1099_v51, %v1099_v51  ;;  %v995_v42 = vmov 0.0  }
  0x34   :  { %v695_v5 = vrot.slane %v995_v42, 4  ;;  %v1309_v44 = vrot.slane %v995_v42, 2 }
  0x37   :  { %262 = vrot.lane.b32.xlu1 %v255_v38, %s994_s18  ;;  %260 = vrot.lane.b32.xlu0 %v253_v20, %s994_s18  ;;  %v549_v20 = vrot.slane %v1187_v45, %v1025_v7 }
  0x39   :  { %v557_v23 = vcombine.high %v549_v20, %v549_v20 }
  0x3b   :  { %277 = vrot.lane.b32.xlu1 %v237_v16, %s994_s18  ;;  %275 = vrot.lane.b32.xlu0 %v236_v1, %s994_s18  ;;  %v1237_v1 = vsel %vm84_vm0, %v302_v60, %v317_v61  ;;  %v484_v16 = vcombine.high %v1129_v3, %v1129_v3 }
  0x3d   :  { %v498_v13 = vrot.slane %v484_v16, %v1025_v7 }
  0x3f   :  { %341 = vrot.lane.b32.xlu1 %v331_v8, %s994_s18  ;;  %279 = vrot.lane.b32.xlu0 %v1217_v9, %s994_s18  ;;  %v500_v51 = vcombine.high %v498_v13, %v498_v13 }
  0x43   :  { %345 = vrot.lane.b32.xlu1 %v338_v39, %s994_s18  ;;  %343 = vrot.lane.b32.xlu0 %v339_v58, %s994_s18  ;;  %v32_v58 = vcombine.high %v1033_v12, %v1033_v12 }
  0x47   :  { %357 = vrot.lane.b32.xlu1 %v1097_v50, %s994_s18  ;;  %347 = vrot.lane.b32.xlu0 %v340_v59, %s994_s18  ;;  %v418_v50 = vrot.slane %v404_v0, %v1025_v7  ;;  %v203_v59 = vcombine.high %v195_v26, %v195_v26 }
  0x49   :  { %v420_v4 = vcombine.high %v418_v50, %v418_v50 }
  0x4b   :  { %361 = vrot.lane.b32.xlu1 %v1237_v1, %s994_s18  ;;  %359 = vrot.lane.b32.xlu0 %v1111_v57, %s994_s18  ;;  %v491_v57 = vrot.slane %v1129_v3, %v1025_v7  ;;  %v616_v3 = vcombine.high %v1163_v29, %v1163_v29 }
  0x4d   :  { %v499_v14 = vcombine.high %v491_v57, %v491_v57  ;;  %v630_v18 = vrot.slane %v616_v3, %v1025_v7 }
  0x4f   :  { %423 = vrot.lane.b32.xlu1 %v419_v37, %s994_s18  ;;  %421 = vrot.lane.b32.xlu0 %v411_v62, %s994_s18  ;;  %v632_v19 = vcombine.high %v630_v18, %v630_v18  ;;  %v202_v37 = vrot.slane %v188_v52, %v1025_v7 }
  0x53   :  { %427 = vrot.lane.b32.xlu1 %v420_v4, %s994_s18  ;;  %425 = vrot.lane.b32.xlu0 %v418_v50, %s994_s18 }
  0x57   :  { %439 = vrot.lane.b32.xlu1 %v1133_v10, %s994_s18  ;;  %437 = vrot.lane.b32.xlu0 %v1127_v2, %s994_s18  ;;  %v623_v2 = vrot.slane %v1163_v29, %v1025_v7 }
  0x59   :  { %v631_v10 = vcombine.high %v623_v2, %v623_v2 }
  0x5b   :  { %501 = vrot.lane.b32.xlu1 %v491_v57, %s994_s18  ;;  %441 = vrot.lane.b32.xlu0 %v1261_v17, %s994_s18 }
  0x5f   :  { %505 = vrot.lane.b32.xlu1 %v498_v13, %s994_s18  ;;  %503 = vrot.lane.b32.xlu0 %v499_v14, %s994_s18  ;;  %v46_v13 = vrot.slane %v32_v58, %v1025_v7  ;;  %v704_v14 = vrot.slane %v203_v59, 2 }
  0x61   :  { %v48_v26 = vcombine.high %v46_v13, %v46_v13 }
  0x63   :  { %517 = vrot.lane.b32.xlu1 %v1153_v24, %s994_s18  ;;  %507 = vrot.lane.b32.xlu0 %v500_v51, %s994_s18  ;;  %v558_v24 = vcombine.high %v556_v22, %v556_v22  ;;  %v204_v51 = vcombine.high %v202_v37, %v202_v37 }
  0x67   :  { %521 = vrot.lane.b32.xlu1 %v1161_v28, %s994_s18  ;;  %519 = vrot.lane.b32.xlu0 %v1167_v34, %s994_s18 }
  0x6b   :  { %635 = vrot.lane.b32.xlu1 %v631_v10, %s994_s18  ;;  %633 = vrot.lane.b32.xlu0 %v623_v2, %s994_s18 }
  0x6f   :  { %639 = vrot.lane.b32.xlu1 %v632_v19, %s994_s18  ;;  %637 = vrot.lane.b32.xlu0 %v630_v18, %s994_s18 }
  0x73   :  { %651 = vrot.lane.b32.xlu1 %v1180_v43, %s994_s18  ;;  %649 = vrot.lane.b32.xlu0 %v1192_v47, %s994_s18 }
  0x77   :  { %559 = vrot.lane.b32.xlu1 %v549_v20, %s993_s0  ;;  %653 = vrot.lane.b32.xlu0 %v1199_v49, %s994_s18 }
  0x7b   :  { %563 = vrot.lane.b32.xlu1 %v556_v22, %s993_s0  ;;  %561 = vrot.lane.b32.xlu0 %v557_v23, %s993_s0 }
  0x7f   :  { %576 = vrot.lane.b32.xlu1 %v1208_v55, %s993_s0  ;;  %565 = vrot.lane.b32.xlu0 %v558_v24, %s993_s0  ;;  %v705_v24 = vrot.slane %v202_v37, 2 }
  0x8d   :  { %v166_v27 = vpop.permute.xlu1 %165  ;;  %v106_v29 = vpop.permute.xlu0 %105 }
  0x8e   :  { %v183_v34 = vsel %vm173_vm4, %v1123_v63, %v166_v27  ;;  %v132_v50 = vsel %vm113_vm5, %v1064_v33, %v106_v29 }
  0x8f   :  { %v689_v35 = vrot.slane %v183_v34, 4  ;;  %v667_v33 = vrot.slane %v132_v50, 6 }
  0x91   :  { %v817_v36 = vsel %vm816_vm2, %v1060_v31, %v689_v35  ;;  %v125_v38 = vpop.permute.xlu1 %124  ;;  %v123_v40 = vpop.permute.xlu0 %122  ;;  %v808_v35 = vsel %vm805_vm1, %v46_v13, %v667_v33 }
  0x92   :  { %v828_v41 = vsel %vm827_vm3, %v817_v36, %v703_v32  ;;  %v128_v6 = vsel %vm113_vm5, %v123_v40, %v125_v38 }
  0x93   :  { %878 = vst [vmem:[#allocation5] sm:$0xff] %v828_v41  ;;  %v672_v45 = vrot.slane %v128_v6, 6 }
  0x95   :  { %v813_v63 = vsel %vm805_vm1, 0.0, %v672_v45  ;;  %v110_v46 = vpop.permute.xlu1 %109  ;;  %v127_v48 = vpop.permute.xlu0 %126 }
  0x96   :  { %v824_v31 = vsel %vm816_vm2, %v813_v63, %v695_v5  ;;  %v129_v53 = vsel %vm113_vm5, %v125_v38, %v127_v48  ;;  %v135_v54 = vsel %vm134_vm6, %v127_v48, 0.0 }
  0x97   :  { %v835_v8 = vsel %vm827_vm3, %v824_v31, %v1309_v44  ;;  %v673_v56 = vrot.slane %v129_v53, 6  ;;  %v674_v39 = vrot.slane %v135_v54, 6 }
  0x98   :  { %885 = vst [vmem:[#allocation5 + $0x38] sm:$0xff] %v835_v8 }
  0x99   :  { %v814_v60 = vsel %vm805_vm1, 0.0, %v673_v56  ;;  %v815_v61 = vsel %vm805_vm1, 0.0, %v674_v39  ;;  %v112_v62 = vpop.permute.xlu1 %111  ;;  %v108_v0 = vpop.permute.xlu0 %107 }
  0x9a   :  { %v825_v4 = vsel %vm816_vm2, %v814_v60, %v695_v5  ;;  %v826_v11 = vsel %vm816_vm2, %v815_v61, %v695_v5  ;;  %v133_v15 = vsel %vm113_vm5, %v112_v62, %v123_v40  ;;  %v114_v3 = vsel %vm113_vm5, %v106_v29, %v108_v0 }
  0x9b   :  { %v836_v12 = vsel %vm827_vm3, %v825_v4, %v1309_v44  ;;  %v837_v57 = vsel %vm827_vm3, %v826_v11, %v1309_v44  ;;  %v671_v16 = vrot.slane %v133_v15, 6  ;;  %v115_v10 = vsel %vm113_vm5, %v108_v0, %v110_v46 }
  0x9c   :  { %886 = vst [vmem:[#allocation5 + $0x40] sm:$0xff] %v836_v12  ;;  %887 = vst [vmem:[#allocation5 + $0x48] sm:$0xff] %v837_v57  ;;  %v116_v20 = vsel %vm113_vm5, %v110_v46, %v112_v62  ;;  %v668_v29 = vrot.slane %v114_v3, 6  ;;  %v669_v32 = vrot.slane %v115_v10, 6  ;;  %v706_v40 = vrot.slane %v204_v51, 2 }
  0x9d   :  { %v812_v2 = vsel %vm805_vm1, 0.0, %v671_v16  ;;  %v170_v18 = vpop.permute.xlu1 %169  ;;  %v168_v19 = vpop.permute.xlu0 %167  ;;  %v670_v36 = vrot.slane %v116_v20, 6 }
  0x9e   :  { %v823_v21 = vsel %vm816_vm2, %v812_v2, %v695_v5  ;;  %v174_v22 = vsel %vm173_vm4, %v166_v27, %v168_v19  ;;  %v175_v7 = vsel %vm173_vm4, %v168_v19, %v170_v18  ;;  %v810_v31 = vsel %vm805_vm1, 0.0, %v669_v32 }
  0x9f   :  { %v834_v23 = vsel %vm827_vm3, %v823_v21, %v1309_v44  ;;  %v690_v25 = vrot.slane %v174_v22, 4  ;;  %v691_v34 = vrot.slane %v175_v7, 4  ;;  %v811_v58 = vsel %vm805_vm1, 0.0, %v670_v36 }
  0xa0   :  { %884 = vst [vmem:[#allocation5 + $0x30] sm:$0xff] %v834_v23 }
  0xa1   :  { %v818_v38 = vsel %vm816_vm2, %v1055_v30, %v690_v25  ;;  %v181_v27 = vpop.permute.xlu1 %180  ;;  %v172_v41 = vpop.permute.xlu0 %171  ;;  %v819_v42 = vsel %vm816_vm2, %v808_v35, %v691_v34  ;;  %v809_v30 = vsel %vm805_vm1, %v48_v26, %v668_v29 }
  0xa2   :  { %v829_v5 = vsel %vm827_vm3, %v818_v38, %v704_v14  ;;  %v176_v6 = vsel %vm173_vm4, %v170_v18, %v172_v41  ;;  %v184_v45 = vsel %vm173_vm4, %v172_v41, %v181_v27  ;;  %v830_v63 = vsel %vm827_vm3, %v819_v42, %v705_v24 }
  0xa3   :  { %879 = vst [vmem:[#allocation5 + $0x8] sm:$0xff] %v829_v5  ;;  %v692_v46 = vrot.slane %v176_v6, 4  ;;  %v693_v48 = vrot.slane %v184_v45, 4  ;;  %v186_v52 = vsel %vm185_vm7, %v181_v27, 0.0  ;;  %880 = vst [vmem:[#allocation5 + $0x10] sm:$0xff] %v830_v63 }
  0xa4   :  { %v694_v53 = vrot.slane %v186_v52, 4 }
  0xa5   :  { %v820_v54 = vsel %vm816_vm2, %v809_v30, %v692_v46  ;;  %v821_v8 = vsel %vm816_vm2, %v810_v31, %v693_v48  ;;  %v259_v56 = vpop.permute.xlu1 %258  ;;  %v257_v39 = vpop.permute.xlu0 %256 }
  0xa6   :  { %v831_v59 = vsel %vm827_vm3, %v820_v54, %v706_v40  ;;  %v832_v60 = vsel %vm827_vm3, %v821_v8, %v1309_v44  ;;  %v822_v61 = vsel %vm816_vm2, %v811_v58, %v694_v53  ;;  %v264_v24 = vsel %vm113_vm5, %v257_v39, %v259_v56 }
  0xa7   :  { %881 = vst [vmem:[#allocation5 + $0x18] sm:$0xff] %v831_v59  ;;  %882 = vst [vmem:[#allocation5 + $0x20] sm:$0xff] %v832_v60  ;;  %v833_v62 = vsel %vm827_vm3, %v822_v61, %v1309_v44  ;;  %v287_v25 = vsel %vm113_vm5, %v1217_v9, %v257_v39 }
  0xa8   :  { %883 = vst [vmem:[#allocation5 + $0x28] sm:$0xff] %v833_v62 }
  0xa9   :  { %v263_v0 = vpop.permute.xlu1 %262  ;;  %v261_v37 = vpop.permute.xlu0 %260 }
  0xaa   :  { %v266_v32 = vsel %vm113_vm5, %v261_v37, %v263_v0 }
  0xad   :  { %v1361_v50 = vpop.permute.xlu1 %277  ;;  %v276_v4 = vpop.permute.xlu0 %275 }
  0xae   :  { %v1379_v34 = vsel %vm113_vm5, %v276_v4, %v1361_v50  ;;  %v288_v35 = vsel %vm113_vm5, %v263_v0, %v276_v4 }
  0xb1   :  { %v342_v11 = vpop.permute.xlu1 %341  ;;  %v1363_v15 = vpop.permute.xlu0 %279 }
  0xb2   :  { %v367_v44 = vsel %vm113_vm5, %v1237_v1, %v342_v11  ;;  %v265_v1 = vsel %vm113_vm5, %v259_v56, %v261_v37  ;;  %v289_v42 = vsel %vm134_vm6, %v1363_v15, 0.0 }
  0xb3   :  { %v718_v7 = vrot.slane %v367_v44, 6 }
  0xb5   :  { %v346_v12 = vpop.permute.xlu1 %345  ;;  %v344_v57 = vpop.permute.xlu0 %343  ;;  %v840_v41 = vsel %vm805_vm1, %v287_v25, %v718_v7 }
  0xb6   :  { %v349_v18 = vsel %vm113_vm5, %v342_v11, %v344_v57  ;;  %v350_v19 = vsel %vm113_vm5, %v344_v57, %v346_v12 }
  0xb7   :  { %v719_v26 = vrot.slane %v349_v18, 6  ;;  %v720_v29 = vrot.slane %v350_v19, 6 }
  0xb9   :  { %v358_v16 = vpop.permute.xlu1 %357  ;;  %v348_v13 = vpop.permute.xlu0 %347  ;;  %v841_v45 = vsel %vm805_vm1, %v264_v24, %v719_v26  ;;  %v842_v63 = vsel %vm805_vm1, %v265_v1, %v720_v29  ;;  %v282_v1 = vsel %vm113_vm5, %v1361_v50, %v1363_v15 }
  0xba   :  { %v351_v23 = vsel %vm113_vm5, %v346_v12, %v348_v13  ;;  %v368_v5 = vsel %vm113_vm5, %v348_v13, %v358_v16 }
  0xbb   :  { %v721_v36 = vrot.slane %v351_v23, 6  ;;  %v722_v54 = vrot.slane %v368_v5, 6 }
  0xbd   :  { %v362_v14 = vpop.permute.xlu1 %361  ;;  %v360_v51 = vpop.permute.xlu0 %359  ;;  %v843_v8 = vsel %vm805_vm1, %v266_v32, %v721_v36  ;;  %v844_v44 = vsel %vm805_vm1, %v288_v35, %v722_v54 }
  0xbe   :  { %v369_v46 = vsel %vm134_vm6, %v362_v14, 0.0  ;;  %v363_v59 = vsel %vm113_vm5, %v358_v16, %v360_v51  ;;  %v364_v60 = vsel %vm113_vm5, %v360_v51, %v362_v14 }
  0xbf   :  { %v725_v0 = vrot.slane %v369_v46, 6  ;;  %v723_v18 = vrot.slane %v363_v59, 6 }
  0xc1   :  { %v424_v33 = vpop.permute.xlu1 %423  ;;  %v422_v2 = vpop.permute.xlu0 %421  ;;  %v847_v32 = vsel %vm805_vm1, %v289_v42, %v725_v0 }
  0xc2   :  { %v447_v20 = vsel %vm113_vm5, %v1261_v17, %v422_v2  ;;  %v429_v38 = vsel %vm113_vm5, %v422_v2, %v424_v33 }
  0xc3   :  { %v741_v17 = vrot.slane %v447_v20, 4  ;;  %v742_v52 = vrot.slane %v429_v38, 4 }
  0xc5   :  { %v428_v3 = vpop.permute.xlu1 %427  ;;  %v426_v10 = vpop.permute.xlu0 %425  ;;  %v850_v30 = vsel %vm816_vm2, %v840_v41, %v741_v17  ;;  %v851_v12 = vsel %vm816_vm2, %v841_v45, %v742_v52 }
  0xc6   :  { %v430_v27 = vsel %vm113_vm5, %v424_v33, %v426_v10  ;;  %v431_v31 = vsel %vm113_vm5, %v426_v10, %v428_v3 }
  0xc7   :  { %v743_v53 = vrot.slane %v430_v27, 4  ;;  %v744_v37 = vrot.slane %v431_v31, 4  ;;  %v845_v27 = vsel %vm805_vm1, %v1379_v34, %v723_v18 }
  0xc9   :  { %v440_v21 = vpop.permute.xlu1 %439  ;;  %v438_v22 = vpop.permute.xlu0 %437  ;;  %v852_v57 = vsel %vm816_vm2, %v842_v63, %v743_v53 }
  0xca   :  { %v448_v56 = vsel %vm113_vm5, %v428_v3, %v438_v22  ;;  %v443_v13 = vsel %vm113_vm5, %v438_v22, %v440_v21  ;;  %v724_v22 = vrot.slane %v364_v60, 6 }
  0xcb   :  { %v745_v33 = vrot.slane %v448_v56, 4  ;;  %v746_v24 = vrot.slane %v443_v13, 4 }
  0xcc   :  { %v846_v50 = vsel %vm805_vm1, %v282_v1, %v724_v22 }
  0xcd   :  { %v502_v40 = vpop.permute.xlu1 %501  ;;  %v442_v9 = vpop.permute.xlu0 %441  ;;  %v854_v25 = vsel %vm816_vm2, %v844_v44, %v745_v33 }
  0xce   :  { %v527_v6 = vsel %vm113_vm5, %v1161_v28, %v502_v40  ;;  %v444_v16 = vsel %vm113_vm5, %v440_v21, %v442_v9  ;;  %v449_v14 = vsel %vm134_vm6, %v442_v9, 0.0  ;;  %v853_v21 = vsel %vm816_vm2, %v843_v8, %v744_v37 }
  0xcf   :  { %v764_v48 = vrot.slane %v527_v6, 2  ;;  %v747_v26 = vrot.slane %v444_v16, 4  ;;  %v748_v29 = vrot.slane %v449_v14, 4  ;;  %v855_v6 = vsel %vm816_vm2, %v845_v27, %v746_v24 }
  0xd1   :  { %v860_v28 = vsel %vm827_vm3, %v850_v30, %v764_v48  ;;  %v506_v39 = vpop.permute.xlu1 %505  ;;  %v504_v58 = vpop.permute.xlu0 %503  ;;  %v856_v45 = vsel %vm816_vm2, %v846_v50, %v747_v26  ;;  %v857_v63 = vsel %vm816_vm2, %v847_v32, %v748_v29 }
  0xd2   :  { %890 = vst [vmem:[#allocation5 + $0x60] sm:$0xff] %v860_v28  ;;  %v509_v61 = vsel %vm113_vm5, %v502_v40, %v504_v58  ;;  %v510_v62 = vsel %vm113_vm5, %v504_v58, %v506_v39 }
  0xd3   :  { %v765_v4 = vrot.slane %v509_v61, 2  ;;  %v766_v11 = vrot.slane %v510_v62, 2 }
  0xd5   :  { %v861_v51 = vsel %vm827_vm3, %v851_v12, %v765_v4  ;;  %v862_v2 = vsel %vm827_vm3, %v852_v57, %v766_v11  ;;  %v518_v3 = vpop.permute.xlu1 %517  ;;  %v508_v10 = vpop.permute.xlu0 %507  ;;  %v786_v12 = vrot.slane %v1180_v43, 6 }
  0xd6   :  { %891 = vst [vmem:[#allocation5 + $0x68] sm:$0xff] %v861_v51  ;;  %892 = vst [vmem:[#allocation5 + $0x70] sm:$0xff] %v862_v2  ;;  %v511_v19 = vsel %vm113_vm5, %v506_v39, %v508_v10  ;;  %v528_v20 = vsel %vm113_vm5, %v508_v10, %v518_v3  ;;  %v785_v39 = vrot.slane %v1192_v47, 6 }
  0xd7   :  { %v767_v7 = vrot.slane %v511_v19, 2  ;;  %v768_v23 = vrot.slane %v528_v20, 2 }
  0xd9   :  { %v863_v17 = vsel %vm827_vm3, %v853_v21, %v767_v7  ;;  %v864_v35 = vsel %vm827_vm3, %v854_v25, %v768_v23  ;;  %v522_v36 = vpop.permute.xlu1 %521  ;;  %v520_v38 = vpop.permute.xlu0 %519 }
  0xda   :  { %893 = vst [vmem:[#allocation5 + $0x78] sm:$0xff] %v863_v17  ;;  %894 = vst [vmem:[#allocation5 + $0x80] sm:$0xff] %v864_v35  ;;  %v529_v40 = vsel %vm134_vm6, %v522_v36, 0.0  ;;  %v523_v9 = vsel %vm113_vm5, %v518_v3, %v520_v38  ;;  %v524_v41 = vsel %vm113_vm5, %v520_v38, %v522_v36 }
  0xdb   :  { %v771_v15 = vrot.slane %v529_v40, 2  ;;  %v769_v42 = vrot.slane %v523_v9, 2  ;;  %v770_v5 = vrot.slane %v524_v41, 2 }
  0xdd   :  { %v867_v34 = vsel %vm827_vm3, %v857_v63, %v771_v15  ;;  %v865_v46 = vsel %vm827_vm3, %v855_v6, %v769_v42  ;;  %v866_v48 = vsel %vm827_vm3, %v856_v45, %v770_v5  ;;  %v636_v52 = vpop.permute.xlu1 %635  ;;  %v634_v30 = vpop.permute.xlu0 %633 }
  0xde   :  { %897 = vst [vmem:[#allocation5 + $0x98] sm:$0xff] %v867_v34  ;;  %895 = vst [vmem:[#allocation5 + $0x88] sm:$0xff] %v865_v46  ;;  %v659_v37 = vsel %vm113_vm5, %v1199_v49, %v634_v30  ;;  %v641_v16 = vsel %vm113_vm5, %v634_v30, %v636_v52 }
  0xdf   :  { %896 = vst [vmem:[#allocation5 + $0x90] sm:$0xff] %v866_v48  ;;  %v787_v14 = vrot.slane %v659_v37, 6  ;;  %v788_v20 = vrot.slane %v641_v16, 6 }
  0xe1   :  { %v640_v31 = vpop.permute.xlu1 %639  ;;  %v638_v53 = vpop.permute.xlu0 %637 }
  0xe2   :  { %v642_v3 = vsel %vm113_vm5, %v636_v52, %v638_v53  ;;  %v643_v10 = vsel %vm113_vm5, %v638_v53, %v640_v31 }
  0xe3   :  { %v789_v22 = vrot.slane %v642_v3, 6  ;;  %v790_v21 = vrot.slane %v643_v10, 6 }
  0xe5   :  { %v652_v54 = vpop.permute.xlu1 %651  ;;  %v650_v8 = vpop.permute.xlu0 %649 }
  0xe6   :  { %v655_v56 = vsel %vm113_vm5, %v650_v8, %v652_v54  ;;  %v660_v28 = vsel %vm113_vm5, %v640_v31, %v650_v8 }
  0xe7   :  { %v791_v58 = vrot.slane %v660_v28, 6  ;;  %v792_v59 = vrot.slane %v655_v56, 6 }
  0xe9   :  { %v874_v60 = vsel %vm805_vm1, 0.0, %v791_v58  ;;  %v875_v61 = vsel %vm805_vm1, 0.0, %v792_v59  ;;  %v560_v62 = vpop.permute.xlu1 %559  ;;  %v654_v0 = vpop.permute.xlu0 %653 }
  0xea   :  { %904 = vst [vmem:[#allocation5 + $0xd0] sm:$0xf] %v874_v60  ;;  %905 = vst [vmem:[#allocation5 + $0xd8] sm:$0xf] %v875_v61  ;;  %v579_v4 = vsel %vm173_vm4, %v1208_v55, %v560_v62  ;;  %v656_v11 = vsel %vm113_vm5, %v652_v54, %v654_v0  ;;  %v661_v47 = vsel %vm134_vm6, %v654_v0, 0.0 }
  0xeb   :  { %v868_v57 = vsel %vm805_vm1, %v579_v4, %v785_v39  ;;  %v793_v13 = vrot.slane %v656_v11, 6  ;;  %v794_v33 = vrot.slane %v661_v47, 6 }
  0xec   :  { %898 = vst [vmem:[#allocation5 + $0xa0] sm:$0xf] %v868_v57 }
  0xed   :  { %v876_v49 = vsel %vm805_vm1, 0.0, %v793_v13  ;;  %v877_v51 = vsel %vm805_vm1, 0.0, %v794_v33  ;;  %v564_v2 = vpop.permute.xlu1 %563  ;;  %v562_v55 = vpop.permute.xlu0 %561 }
  0xee   :  { %906 = vst [vmem:[#allocation5 + $0xe0] sm:$0xf] %v876_v49  ;;  %907 = vst [vmem:[#allocation5 + $0xe8] sm:$0xf] %v877_v51  ;;  %v567_v43 = vsel %vm173_vm4, %v560_v62, %v562_v55  ;;  %v568_v44 = vsel %vm173_vm4, %v562_v55, %v564_v2 }
  0xef   :  { %v869_v18 = vsel %vm805_vm1, %v567_v43, %v786_v12  ;;  %v870_v19 = vsel %vm805_vm1, %v568_v44, %v787_v14 }
  0xf0   :  { %899 = vst [vmem:[#allocation5 + $0xa8] sm:$0xf] %v869_v18  ;;  %900 = vst [vmem:[#allocation5 + $0xb0] sm:$0xf] %v870_v19 }
  0xf1   :  { %v577_v7 = vpop.permute.xlu1 %576  ;;  %v566_v23 = vpop.permute.xlu0 %565 }
  0xf2   :  { %v581_v24 = vsel %vm185_vm7, %v577_v7, 0.0  ;;  %v569_v25 = vsel %vm173_vm4, %v564_v2, %v566_v23  ;;  %v580_v26 = vsel %vm173_vm4, %v566_v23, %v577_v7 }
  0xf3   :  { %v873_v29 = vsel %vm805_vm1, %v581_v24, %v790_v21  ;;  %v871_v1 = vsel %vm805_vm1, %v569_v25, %v788_v20  ;;  %v872_v32 = vsel %vm805_vm1, %v580_v26, %v789_v22 }
  0xf4   :  { %903 = vst [vmem:[#allocation5 + $0xc8] sm:$0xf] %v873_v29  ;;  %901 = vst [vmem:[#allocation5 + $0xb8] sm:$0xf] %v871_v1 }
  0xf5   :  { %902 = vst [vmem:[#allocation5 + $0xc0] sm:$0xf] %v872_v32 }
  0xf6   :  { %976 = shalt.err (!%p973_p12)
}
  0xf7   :  { %s977_s24 = scalar_lea.hbm %s1473_s1, 3840 }
  0xf8   :  { %p978_p13 = scmp.ne.s32.totalorder %s1473_s1, %s977_s24  ;;  %p981_p0 = scmp.lt.u32.totalorder %s977_s24, %s1473_s1 }
  0xfa   :  { %p983_p1 = pnand %p981_p0, %p978_p13 }
  0xfc   :  { %986 = shalt.err (!%p983_p1)
}
  0xfd   :  { %s997_s29 = smov 1280   ;;  %s998_s30 = smov 80  }
  0xfe   :  { %919 = dma.vmem_to_hbm [thread:$0]  %s914_s20, 3840, %s1473_s1, [#allocation4], %s997_s29, %s997_s29, %s998_s30  }
  0xff   :  { %989 = dma.done.wait [#allocation4], 3840  }
 0x100   :  { %990 = vsyncadd [#allocation4], 4294963456 }
 0x101   :  { %923 = vsyncpa [#allocation3], 1 }
 0x102   :  { %924 = vsyncpa [#allocation4], 1 }

</bundles_post_ra>
